<compile_context>
chip_gen: v5e
topology: v5e:2x2
jax: 0.10.0
libtpu: 0.0.40
codegen_flags: <defaults>
</compile_context>

<pallas_src>
import functools

import jax
import jax.numpy as jnp
from jax.experimental import pallas as pl
from jax.experimental.pallas import tpu as pltpu


def _round_up(x: int, m: int) -> int:
    return ((x + m - 1) // m) * m


def _vmem_limit_bytes() -> int:
    """Per-generation VMEM budget with headroom for compiler scratch."""
    cap = 64 * 1024 * 1024  # conservative default = v7x physical VMEM per TC
    try:
        info = pltpu.get_tpu_info()
        cap = int(getattr(info, "vmem_capacity_bytes", cap))
    except Exception:
        pass
    # Leave >=16 MiB headroom; never ask for less than 32 MiB or more than 96.
    return max(32 * 1024 * 1024, min(cap - 16 * 1024 * 1024, 96 * 1024 * 1024))


def _linear_kernel(x_ref, w_ref, b_ref, o_ref, acc_ref):
    # Grid = (j: out tiles, i: batch tiles, k: K tiles)   [K innermost]
    # x_ref: (TM, TK)  w_ref: (TK, TN)  b_ref: (1, TN)  o_ref: (TM, TN)
    k = pl.program_id(2)

    @pl.when(k == 0)
    def _():
        acc_ref[...] = jnp.zeros_like(acc_ref)

    acc_ref[...] += jnp.dot(
        x_ref[...], w_ref[...], preferred_element_type=jnp.float32
    )

    @pl.when(k == pl.num_programs(2) - 1)
    def _():
        # Bias add in f32, single cast on the way out.
        o_ref[...] = (acc_ref[...] + b_ref[...]).astype(o_ref.dtype)


def prepare_linear_params(weight, bias, *, compute_dtype=jnp.float32):
    """One-time parameter prep (hoisted out of the per-call path).

    weight: (OUT, IN)  PyTorch nn.Linear layout
    bias:   (OUT,)
    Returns (w_t_padded, bias2d_padded, meta) ready for `linear_forward`.
    """
    out_size, in_size = weight.shape

    # Tile sizes (multiples of 128 on lane dims; bounded so double-buffered
    # tiles + accumulator stay well under a v7x 64 MiB VMEM budget).
    tk = min(512, _round_up(in_size, 128))
    tn = min(512, _round_up(out_size, 128))
    k_p = _round_up(in_size, tk)       # K padded so every K block is real+zeros
    out_p = _round_up(out_size, tn)    # OUT padded -> lane-dense unmasked stores

    w_t = weight.T.astype(compute_dtype)                   # (IN, OUT) once
    w_t = jnp.pad(w_t, ((0, k_p - in_size), (0, out_p - out_size)))
    bias2d = jnp.pad(bias.astype(jnp.float32), (0, out_p - out_size)).reshape(1, out_p)

    meta = dict(in_size=in_size, out_size=out_size,
                k_p=k_p, out_p=out_p, tk=tk, tn=tn,
                compute_dtype=compute_dtype)
    return w_t, bias2d, meta


def linear_forward(x, w_t, bias2d, meta):
    """y = x @ W^T + b with a tiled, K-accumulating Pallas kernel."""
    batch, in_size = x.shape
    assert in_size == meta["in_size"]
    k_p, out_p = meta["k_p"], meta["out_p"]
    tk, tn = meta["tk"], meta["tn"]
    out_size = meta["out_size"]
    compute_dtype = meta["compute_dtype"]

    # Batch: pad only to the sublane multiple; Pallas clips the partial block.
    batch_p = _round_up(batch, 8)
    tm = min(512, batch_p)
    x_p = x.astype(compute_dtype)
    if batch_p != batch or k_p != in_size:
        x_p = jnp.pad(x_p, ((0, batch_p - batch), (0, k_p - in_size)))

    grid = (out_p // tn, pl.cdiv(batch_p, tm), k_p // tk)

    flops = 2 * batch * out_size * in_size
    bytes_accessed = (
        x_p.size * x_p.dtype.itemsize
        + w_t.size * w_t.dtype.itemsize
        + bias2d.size * bias2d.dtype.itemsize
        + batch_p * out_p * 4
    )

    y_padded = pl.pallas_call(
        _linear_kernel,
        out_shape=jax.ShapeDtypeStruct((batch_p, out_p), jnp.float32),
        grid=grid,
        in_specs=[
            # x tile streams over (batch, K).
            pl.BlockSpec((tm, tk), lambda j, i, k: (i, k)),
            # W strip: constant across consecutive batch tiles when K fits one
            # tile -> fetched once per out tile instead of once per batch tile.
            pl.BlockSpec((tk, tn), lambda j, i, k: (k, j)),
            pl.BlockSpec((1, tn), lambda j, i, k: (0, j)),
        ],
        out_specs=pl.BlockSpec((tm, tn), lambda j, i, k: (i, j)),
        scratch_shapes=[pltpu.VMEM((tm, tn), jnp.float32)],
        compiler_params=pltpu.CompilerParams(
            dimension_semantics=("parallel", "parallel", "arbitrary"),
            vmem_limit_bytes=_vmem_limit_bytes(),
        ),
        cost_estimate=pl.CostEstimate(
            flops=flops, transcendentals=0, bytes_accessed=bytes_accessed
        ),
    )(x_p, w_t, bias2d)

    # Slice away batch / output-feature padding.
    return y_padded[:batch, :out_size]


def linear_regression_forward(x, weight, bias, *, compute_dtype=jnp.float32):
    """Convenience wrapper: prep params + run the kernel.

    For repeated calls (training/inference loops), call prepare_linear_params
    once and reuse its outputs instead of re-doing the transpose/pad here.
    """
    w_t, bias2d, meta = prepare_linear_params(
        weight, bias, compute_dtype=compute_dtype
    )
    return linear_forward(x, w_t, bias2d, meta)


if __name__ == "__main__":
    # Small shapes consistent with the module: input_size=32, output_size=8, batch=8
    input_size, output_size, batch = 32, 8, 8

    key = jax.random.PRNGKey(0)
    kx, kw, kb = jax.random.split(key, 3)

    # Deterministic init (mimics nn.Linear's uniform(-1/sqrt(in), 1/sqrt(in)))
    bound = 1.0 / jnp.sqrt(jnp.float32(input_size))
    weight = jax.random.uniform(kw, (output_size, input_size), jnp.float32, -bound, bound)
    bias = jax.random.uniform(kb, (output_size,), jnp.float32, -bound, bound)
    x = jax.random.normal(kx, (batch, input_size), jnp.float32)

    y_ref = x @ weight.T + bias

    # f32 path (default, tight tolerance).
    y = linear_regression_forward(x, weight, bias)
    jax.block_until_ready(y)
    assert y.shape == (batch, output_size)
    assert jnp.allclose(y, y_ref, atol=1e-5, rtol=1e-5)

    # bf16 compute path (recommended on v6e/v7x bf16-native MXUs); f32 accumulation.
    y_bf16 = linear_regression_forward(x, weight, bias, compute_dtype=jnp.bfloat16)
    jax.block_until_ready(y_bf16)
    assert y_bf16.shape == (batch, output_size)
    assert jnp.allclose(y_bf16, y_ref, atol=3e-2, rtol=3e-2)

    print("KERNEL_OK")
</pallas_src>

<mosaic_0001>
module attributes {stable_mosaic.version = 11 : i64} {
  func.func @_linear_kernel(%arg0: i32, %arg1: i32, %arg2: i32, %arg3: memref<8x128xf32, #tpu.memory_space<vmem>>, %arg4: memref<128x128xf32, #tpu.memory_space<vmem>>, %arg5: memref<1x128xf32, #tpu.memory_space<vmem>>, %arg6: memref<8x128xf32, #tpu.memory_space<vmem>>, %arg7: memref<8x128xf32, #tpu.memory_space<vmem>>) attributes {dimension_semantics = [#tpu.dimension_semantics<parallel>, #tpu.dimension_semantics<parallel>, #tpu.dimension_semantics<arbitrary>], iteration_bounds = array<i64: 1, 1, 1>, scalar_prefetch = 0 : i64, scratch_operands = 1 : i64, tpu.core_type = #tpu.core_type<tc>, window_params = [{transform_indices = @transform_0, window_bounds = array<i64: 8, 128>}, {transform_indices = @transform_1, window_bounds = array<i64: 128, 128>}, {transform_indices = @transform_2, window_bounds = array<i64: 1, 128>}, {transform_indices = @transform_3, window_bounds = array<i64: 8, 128>}]} {
    %c0_i32 = arith.constant 0 : i32
    %0 = arith.cmpi eq, %arg2, %c0_i32 : i32
    %1 = arith.extui %0 : i1 to i32
    %c0_i32_0 = arith.constant 0 : i32
    %2 = arith.cmpi ne, %1, %c0_i32_0 : i32
    scf.if %2 {
      %cst_10 = arith.constant 0.000000e+00 : f32
      %12 = vector.broadcast %cst_10 : f32 to vector<8x128xf32>
      %c0_11 = arith.constant 0 : index
      %c0_12 = arith.constant 0 : index
      %13 = vector.load %arg7[%c0_11, %c0_12] : memref<8x128xf32, #tpu.memory_space<vmem>>, vector<8x128xf32>
      tpu.vector_store %arg7[%c0_11, %c0_12], %12 {strides = array<i32>} : memref<8x128xf32, #tpu.memory_space<vmem>>, vector<8x128xf32>,
    } else {
    }
    %c0 = arith.constant 0 : index
    %c0_1 = arith.constant 0 : index
    %3 = vector.load %arg7[%c0, %c0_1] : memref<8x128xf32, #tpu.memory_space<vmem>>, vector<8x128xf32>
    %c0_2 = arith.constant 0 : index
    %c0_3 = arith.constant 0 : index
    %4 = vector.load %arg3[%c0_2, %c0_3] : memref<8x128xf32, #tpu.memory_space<vmem>>, vector<8x128xf32>
    %c0_4 = arith.constant 0 : index
    %c0_5 = arith.constant 0 : index
    %5 = vector.load %arg4[%c0_4, %c0_5] : memref<128x128xf32, #tpu.memory_space<vmem>>, vector<128x128xf32>
    %cst = arith.constant dense<0.000000e+00> : vector<8x128xf32>
    %6 = tpu.matmul %4, %5, %cst {dimension_numbers = #tpu.dot_dimension_numbers<[1], [0], [0], [1], [0, 0, 1, 1], [], []>} : vector<8x128xf32>, vector<128x128xf32>, vector<8x128xf32> -> vector<8x128xf32>
    %7 = arith.addf %3, %6 : vector<8x128xf32>
    %c0_6 = arith.constant 0 : index
    %c0_7 = arith.constant 0 : index
    %8 = vector.load %arg7[%c0_6, %c0_7] : memref<8x128xf32, #tpu.memory_space<vmem>>, vector<8x128xf32>
    tpu.vector_store %arg7[%c0_6, %c0_7], %7 {strides = array<i32>} : memref<8x128xf32, #tpu.memory_space<vmem>>, vector<8x128xf32>,
    %c0_i32_8 = arith.constant 0 : i32
    %9 = arith.cmpi eq, %arg2, %c0_i32_8 : i32
    %10 = arith.extui %9 : i1 to i32
    %c0_i32_9 = arith.constant 0 : i32
    %11 = arith.cmpi ne, %10, %c0_i32_9 : i32
    scf.if %11 {
      %c0_10 = arith.constant 0 : index
      %c0_11 = arith.constant 0 : index
      %12 = vector.load %arg7[%c0_10, %c0_11] : memref<8x128xf32, #tpu.memory_space<vmem>>, vector<8x128xf32>
      %c0_12 = arith.constant 0 : index
      %c0_13 = arith.constant 0 : index
      %13 = vector.load %arg5[%c0_12, %c0_13] : memref<1x128xf32, #tpu.memory_space<vmem>>, vector<1x128xf32>
      %14 = vector.broadcast %13 : vector<1x128xf32> to vector<8x128xf32>
      %15 = arith.addf %12, %14 : vector<8x128xf32>
      %c0_14 = arith.constant 0 : index
      %c0_15 = arith.constant 0 : index
      %16 = vector.load %arg6[%c0_14, %c0_15] : memref<8x128xf32, #tpu.memory_space<vmem>>, vector<8x128xf32>
      tpu.vector_store %arg6[%c0_14, %c0_15], %15 {strides = array<i32>} : memref<8x128xf32, #tpu.memory_space<vmem>>, vector<8x128xf32>,
    } else {
    }
    return
  }
  func.func @transform_0(%arg0: i32, %arg1: i32, %arg2: i32) -> (i32, i32) {
    %c0_i32 = arith.constant 0 : i32
    return %arg1, %arg2 : i32, i32
  }
  func.func @transform_1(%arg0: i32, %arg1: i32, %arg2: i32) -> (i32, i32) {
    %c0_i32 = arith.constant 0 : i32
    return %arg2, %arg0 : i32, i32
  }
  func.func @transform_2(%arg0: i32, %arg1: i32, %arg2: i32) -> (i32, i32) {
    %c0_i32 = arith.constant 0 : i32
    %c0_i32_0 = arith.constant 0 : i32
    return %c0_i32, %arg0 : i32, i32
  }
  func.func @transform_3(%arg0: i32, %arg1: i32, %arg2: i32) -> (i32, i32) {
    %c0_i32 = arith.constant 0 : i32
    return %arg1, %arg0 : i32, i32
  }
}

</mosaic_0001>

<bundles_post_ra>
// kernel: tpu_custom_call.1
= control target key start
LH: loop header
LB: loop body
LE: loop exit
PB: predicated region body
PF: predicated region fallthrough
CT: control target
= control target key end

     0   :  { %8 = vsyncpa [#allocation4], 0  ;;  %s239_s0 = inlined_call_operand.hbm [shape: f32[8,128], index: 0, kind: input, shape index: {}]   ;;  %s240_s1 = inlined_call_operand.hbm [shape: f32[128,128], index: 1, kind: input, shape index: {}]   ;;  %s241_s2 = inlined_call_operand.vmem [shape: f32[1,128], index: 2, kind: input, shape index: {}]   ;;  %s242_s3 = inlined_call_operand.hbm [shape: f32[8,128], index: 3, kind: output, shape index: {}]  }
   0x1   :  { %9 = vsyncpa [#allocation7], 0 }
   0x2   :  { %10 = vsyncpa [#allocation5], 0  ;;  %s16_s14 = sshll.u32 %s239_s0, 4  ;;  %s202_s15 = smov [#allocation3]   ;;  %s17_s14 = int_to_ptr.hbm [resolvable:$true] %s16_s14 }
   0x3   :  { %s18_s16 = sshll.u32 %s202_s15, 4  ;;  %s26_s19 = sshll.u32 %s240_s1, 4  ;;  %s19_s16 = int_to_ptr.vmem [resolvable:$true] %s18_s16  ;;  %s27_s19 = int_to_ptr.hbm [resolvable:$true] %s26_s19 }
   0x4   :  { %21 = dma.hbm_to_vmem [thread:$0]  %s17_s14, 128, %s19_s16, [#allocation4]  }
   0x5   :  { %s203_s20 = smov [#allocation6]   ;;  %s204_s22 = smov 128  }
   0x6   :  { %s28_s21 = sshll.u32 %s203_s20, 4  ;;  %s205_s23 = smov 8   ;;  %s29_s21 = int_to_ptr.vmem [resolvable:$true] %s28_s21 }
   0x7   :  { %34 = dma.hbm_to_vmem [thread:$0]  %s27_s19, 2048, %s29_s21, [#allocation7], %s204_s22, %s204_s22, %s205_s23  }
   0x8   :  { %196 = dma.done.wait [#allocation4], 128  }
   0x9   :  { %197 = vsyncadd [#allocation4], 4294967168 }
   0xa   :  { %198 = dma.done.wait [#allocation7], 2048  }
   0xb   :  { %199 = vsyncadd [#allocation7], 4294965248  ;;  %v67_v0 = vld [vmem:[#allocation6 + $0x78] sm:$0xff]  ;;  %v66_v1 = vld [vmem:[#allocation6 + $0x70] sm:$0xff]  ;;  %s206_s24 = smov [#allocation8]   ;;  %s107_s28 = sshll.u32 %s242_s3, 4  ;;  %s108_s28 = int_to_ptr.hbm [resolvable:$true] %s107_s28 }
   0xc   :  { %68 = vmatpush.msra.mxu0 %v67_v0  ;;  %v65_v2 = vld [vmem:[#allocation6 + $0x68] sm:$0xff]  ;;  %v64_v3 = vld [vmem:[#allocation6 + $0x60] sm:$0xff]  ;;  %v63_v4 = vld [vmem:[#allocation6 + $0x58] sm:$0xff]  ;;  %s105_s25 = sshll.u32 %s206_s24, 4  ;;  %s106_s25 = int_to_ptr.vmem [resolvable:$true] %s105_s25 }
   0xd   :  { %v62_v5 = vld [vmem:[#allocation6 + $0x50] sm:$0xff]  ;;  %v61_v6 = vld [vmem:[#allocation6 + $0x48] sm:$0xff]  ;;  %v60_v7 = vld [vmem:[#allocation6 + $0x40] sm:$0xff] }
   0xe   :  { %69 = vmatpush.msra.mxu0 %v66_v1  ;;  %v59_v8 = vld [vmem:[#allocation6 + $0x38] sm:$0xff]  ;;  %v58_v9 = vld [vmem:[#allocation6 + $0x30] sm:$0xff]  ;;  %v57_v10 = vld [vmem:[#allocation6 + $0x28] sm:$0xff] }
   0xf   :  { %v56_v11 = vld [vmem:[#allocation6 + $0x20] sm:$0xff]  ;;  %v55_v12 = vld [vmem:[#allocation6 + $0x18] sm:$0xff]  ;;  %v54_v13 = vld [vmem:[#allocation6 + $0x10] sm:$0xff] }
  0x10   :  { %70 = vmatpush.msra.mxu0 %v65_v2  ;;  %v53_v14 = vld [vmem:[#allocation6 + $0x8] sm:$0xff]  ;;  %v52_v15 = vld [vmem:[#allocation6] sm:$0xff]  ;;  %v51_v16 = vld [vmem:[#allocation3] sm:$0xff] }
  0x11   :  { %v123_v17 = vld [vmem:[%s241_s2] ss:$0 sm:$0xff] }
  0x12   :  { %71 = vmatpush.msra.mxu0 %v64_v3 }
  0x14   :  { %72 = vmatpush.msra.mxu0 %v63_v4 }
  0x16   :  { %73 = vmatpush.msra.mxu0 %v62_v5 }
  0x18   :  { %74 = vmatpush.msra.mxu0 %v61_v6 }
  0x1a   :  { %75 = vmatpush.msra.mxu0 %v60_v7 }
  0x1c   :  { %76 = vmatpush.msra.mxu0 %v59_v8 }
  0x1e   :  { %77 = vmatpush.msra.mxu0 %v58_v9 }
  0x20   :  { %78 = vmatpush.msra.mxu0 %v57_v10 }
  0x22   :  { %79 = vmatpush.msra.mxu0 %v56_v11 }
  0x24   :  { %80 = vmatpush.msra.mxu0 %v55_v12 }
  0x26   :  { %81 = vmatpush.msra.mxu0 %v54_v13 }
  0x28   :  { %82 = vmatpush.msra.mxu0 %v53_v14 }
  0x2a   :  { %83 = vmatpush.msra.mxu0 %v52_v15 }
  0x2b   :  { %84 = vmatmul.f32.vlgmr.msra.gmra.mxu0 %v51_v16 }
  0xa8   :  { %v85_v18 = vpop.f32.mrf.mxu0 }
  0xa9   :  { %v98_v19 = vadd.f32 %v123_v17, %v85_v18 }
  0xab   :  { %99 = vst [vmem:[#allocation8] sm:$0xff] %v98_v19 }
  0xac   :  { %110 = dma.vmem_to_hbm [thread:$0]  %s106_s25, 128, %s108_s28, [#allocation5]  }
  0xad   :  { %200 = dma.done.wait [#allocation5], 128  }
  0xae   :  { %201 = vsyncadd [#allocation5], 4294967168 }
  0xaf   :  { %115 = vsyncpa [#allocation4], 1 }
  0xb0   :  { %116 = vsyncpa [#allocation7], 1 }
  0xb1   :  { %117 = vsyncpa [#allocation5], 1 }

</bundles_post_ra>
